<compile_context>
chip_gen: v7x
topology: tpu7x:2x2x1
jax: 0.10.0
libtpu: 0.0.40
codegen_flags: <defaults>
</compile_context>

<pallas_src>
import numpy as np
import jax
import jax.numpy as jnp
from jax.experimental import pallas as pl
from jax.experimental.pallas import tpu as pltpu

_EPS = 1e-8      # torch.nn.CosineSimilarity default eps
_LANE = 128      # TPU lane width


def get_kinematic_parents(joint_preset=None):
    # Deterministic default 16-joint skeleton (root=0; every joint's parent has
    # a smaller index).  parents[0] == 0 by convention.
    del joint_preset
    return [0, 0, 1, 2, 3, 1, 5, 6, 1, 8, 9, 10, 8, 12, 13, 14]


def _round_up(x, m):
    return ((x + m - 1) // m) * m


def _make_kernel(pred_spec, gt_spec, n_bones, lane_tile, batch):
    """Build the kernel closure for one (layout, flags) configuration."""

    def extract(ref, spec):
        # ref: (3 * rows, lane_tile) slab; returns 3 planes of (n_bones, lane_tile) f32
        rows = spec["rows"]
        planes = []
        for d in range(3):                              # x, y, z planes
            base = d * rows
            if spec["mode"] == "slice":                 # input already holds bone vectors
                s = spec["start"]
                planes.append(
                    ref[base + s:base + s + n_bones, :].astype(jnp.float32))
                continue
            c0 = spec["child0"]
            child = ref[base + c0:base + c0 + n_bones, :].astype(jnp.float32)
            prev = ref[base + c0 - 1:base + c0 - 1 + n_bones, :].astype(jnp.float32)
            bones = child - prev                        # parent == previous joint (most bones)
            if spec["fixes"]:
                row_id = jax.lax.broadcasted_iota(jnp.int32, (n_bones, 1), 0)
                for bi, prow in spec["fixes"]:          # limb roots: parent != previous joint
                    corr = (child[bi:bi + 1, :]
                            - ref[base + prow:base + prow + 1, :].astype(jnp.float32))
                    bones = jnp.where(row_id == bi, corr, bones)
            planes.append(bones)
        return planes

    def kernel(pred_ref, gt_ref, out_ref):
        px, py, pz = extract(pred_ref, pred_spec)
        gx, gy, gz = extract(gt_ref, gt_spec)

        dot = px * gx + py * gy + pz * gz               # xyz reduce = unrolled VPU adds
        n1 = px * px + py * py + pz * pz
        n2 = gx * gx + gy * gy + gz * gz
        # cos = dot / max(|a||b|, eps) == dot * rsqrt(max(|a|^2 |b|^2, eps^2))
        cos = dot * jax.lax.rsqrt(jnp.maximum(n1 * n2, _EPS * _EPS))

        acc = jnp.sum(cos, axis=0, keepdims=True)       # (1, lane_tile) per-batch bone sums
        # Mask lanes >= batch: covers both the explicit zero padding and any
        # garbage lanes of a partial tail block.
        lane = (jax.lax.broadcasted_iota(jnp.int32, (1, lane_tile), 1)
                + pl.program_id(0) * lane_tile)
        acc = jnp.where(lane < batch, acc, 0.0)

        partial = jnp.sum(acc, axis=1, keepdims=True)   # (1, 1) per-step partial
        out_ref[...] = jnp.broadcast_to(partial, (1, _LANE))

    return kernel


def loss_func_cos_sim(pose_predicted, pose_gt, *, pred_rot=False,
                      joint_preset=None, estimate_head=True,
                      max_lane_tile=16384, compute_dtype=None):
    """JAX/Pallas equivalent of LossFuncCosSim.forward."""
    parents = list(get_kinematic_parents(joint_preset))
    J = len(parents)

    # ---- (child, parent) pairs for a *pose* tensor, in input-row space ----
    def pose_pairs_and_rows():
        if estimate_head:
            return [(c, parents[c]) for c in range(1, J)], J, False
        # Head joint missing from the input; bone 0 is dropped downstream, so the
        # prepended zero joint is only needed if a remaining bone's parent is it.
        if all(parents[c] >= 1 for c in range(2, J)):
            return [(c - 1, parents[c] - 1) for c in range(2, J)], J - 1, False
        return [(c, parents[c]) for c in range(2, J)], J, True

    def diff_spec(pairs, rows):
        c0 = pairs[0][0]
        # children are always contiguous (bone b's child is joint b [+offset])
        assert [c for c, _ in pairs] == list(range(c0, c0 + len(pairs)))
        fixes = [(bi, p) for bi, (c, p) in enumerate(pairs) if p != c - 1]
        return dict(mode="diff", rows=rows, child0=c0, fixes=fixes)

    def to_slab(x, rows, needs_zero):
        if needs_zero:
            x = jnp.concatenate((jnp.zeros((x.shape[0], 1, 3), x.dtype), x), axis=1)
        assert x.shape[1] == rows and x.shape[2] == 3
        slab = jnp.transpose(x, (2, 1, 0)).reshape(3 * rows, x.shape[0])
        if compute_dtype is not None:
            slab = slab.astype(compute_dtype)   # optional bf16 read (cos is scale-invariant)
        return slab

    # ---- ground truth: raw poses, bones formed in-kernel ----
    gt_pairs, gt_rows, gt_needs_zero = pose_pairs_and_rows()
    n_bones = len(gt_pairs)
    gt_spec = diff_spec(gt_pairs, gt_rows)
    gt_slab = to_slab(pose_gt, gt_rows, gt_needs_zero)

    # ---- predictions ----
    if pred_rot:
        # predicted tensor already *is* the bone vectors
        n_bv = pose_predicted.shape[1]
        start = 0 if estimate_head else 1        # estimate_head=False drops bone 0
        assert n_bv - start == n_bones
        pred_spec = dict(mode="slice", rows=n_bv, start=start)
        pred_slab = to_slab(pose_predicted, n_bv, False)
    else:
        pred_spec = gt_spec
        pred_slab = to_slab(pose_predicted, gt_rows, gt_needs_zero)

    B = pose_gt.shape[0]
    assert pose_predicted.shape[0] == B

    # ---- batch tiling: pad only to 128; cdiv grid; mask handles the tail ----
    padded_b = _round_up(B, _LANE)
    if padded_b != B:
        pad = ((0, 0), (0, padded_b - B))        # zero bone vectors -> cos == 0
        pred_slab = jnp.pad(pred_slab, pad)
        gt_slab = jnp.pad(gt_slab, pad)

    max_lane_tile = max(_LANE, (max_lane_tile // _LANE) * _LANE)
    # >= 2 grid steps for larger batches (v7x megacore); one step otherwise.
    target_steps = 2 if padded_b >= 4 * _LANE else 1
    lane_tile = min(max_lane_tile,
                    _round_up(pl.cdiv(padded_b, target_steps), _LANE))
    n_steps = pl.cdiv(padded_b, lane_tile)       # last block may be partial (masked)

    kernel = _make_kernel(pred_spec, gt_spec, n_bones, lane_tile, B)

    partials = pl.pallas_call(
        kernel,
        out_shape=jax.ShapeDtypeStruct((1, _LANE * n_steps), jnp.float32),
        grid=(n_steps,),
        in_specs=[pl.BlockSpec((pred_slab.shape[0], lane_tile), lambda i: (0, i)),
                  pl.BlockSpec((gt_slab.shape[0], lane_tile), lambda i: (0, i))],
        out_specs=pl.BlockSpec((1, _LANE), lambda i: (0, i)),
        compiler_params=pltpu.CompilerParams(
            dimension_semantics=("parallel",),
            vmem_limit_bytes=64 * 1024 * 1024),
    )(pred_slab, gt_slab)

    # one scalar per grid step; tiny final reduce + mean over the real batch
    per_step = partials.reshape(n_steps, _LANE)[:, 0]
    return jnp.sum(per_step) / jnp.float32(B)


def _reference_loss(pose_predicted, pose_gt, parents):
    # Pure-JAX reference mirroring the PyTorch forward (pred_rot=False,
    # estimate_head=True).
    pbv = (pose_predicted - pose_predicted[:, parents, :])[:, 1:, :]
    gbv = (pose_gt - pose_gt[:, parents, :])[:, 1:, :]
    dot = jnp.sum(pbv * gbv, axis=2)
    denom = jnp.sqrt(jnp.maximum(jnp.sum(pbv * pbv, 2) * jnp.sum(gbv * gbv, 2),
                                 _EPS * _EPS))
    cos = dot / denom
    return jnp.mean(jnp.sum(cos, axis=1), axis=0)


if __name__ == "__main__":
    parents = jnp.asarray(get_kinematic_parents(None), dtype=jnp.int32)

    # Small canonical shape: batch=2, 16 joints, xyz.
    B, J, D = 2, 16, 3
    key = jax.random.PRNGKey(0)
    k1, k2, k3, k4 = jax.random.split(key, 4)
    pose_pred = jax.random.normal(k1, (B, J, D), dtype=jnp.float32)
    pose_gt = jax.random.normal(k2, (B, J, D), dtype=jnp.float32)

    loss = jax.block_until_ready(loss_func_cos_sim(pose_pred, pose_gt))
    ref = jax.block_until_ready(_reference_loss(pose_pred, pose_gt, parents))
    assert np.allclose(np.asarray(loss), np.asarray(ref),
                       rtol=1e-4, atol=1e-4), (loss, ref)

    # Non-multiple-of-128 batch with a small lane tile: exercises the
    # multi-step "parallel" grid and a partial tail block (384 cols, 256 tile)
    # guarded by the in-kernel lane mask.
    B2 = 300
    pose_pred2 = jax.random.normal(k3, (B2, J, D), dtype=jnp.float32)
    pose_gt2 = jax.random.normal(k4, (B2, J, D), dtype=jnp.float32)
    loss2 = jax.block_until_ready(
        loss_func_cos_sim(pose_pred2, pose_gt2, max_lane_tile=256))
    ref2 = jax.block_until_ready(_reference_loss(pose_pred2, pose_gt2, parents))
    assert np.allclose(np.asarray(loss2), np.asarray(ref2),
                       rtol=1e-4, atol=1e-4), (loss2, ref2)

    print("KERNEL_OK")
</pallas_src>

<mosaic_0001>
module attributes {stable_mosaic.version = 11 : i64} {
  func.func @kernel(%arg0: i32, %arg1: memref<48x128xf32, #tpu.memory_space<vmem>>, %arg2: memref<48x128xf32, #tpu.memory_space<vmem>>, %arg3: memref<1x128xf32, #tpu.memory_space<vmem>>) attributes {dimension_semantics = [#tpu.dimension_semantics<parallel>], iteration_bounds = array<i64: 1>, scalar_prefetch = 0 : i64, scratch_operands = 0 : i64, tpu.core_type = #tpu.core_type<tc>, window_params = [{transform_indices = @transform_0, window_bounds = array<i64: 48, 128>}, {transform_indices = @transform_1, window_bounds = array<i64: 48, 128>}, {transform_indices = @transform_2, window_bounds = array<i64: 1, 128>}]} {
    %c1 = arith.constant 1 : index
    %c0 = arith.constant 0 : index
    %0 = vector.load %arg1[%c1, %c0] : memref<48x128xf32, #tpu.memory_space<vmem>>, vector<15x128xf32>
    %c0_0 = arith.constant 0 : index
    %c0_1 = arith.constant 0 : index
    %1 = vector.load %arg1[%c0_0, %c0_1] : memref<48x128xf32, #tpu.memory_space<vmem>>, vector<15x128xf32>
    %2 = arith.subf %0, %1 : vector<15x128xf32>
    %3 = tpu.iota {dimensions = array<i32: 0>} : vector<15x1xi32>
    %4 = vector.extract_strided_slice %0 {offsets = [4, 0], sizes = [1, 128], strides = [1, 1]} : vector<15x128xf32> to vector<1x128xf32>
    %c1_2 = arith.constant 1 : index
    %c0_3 = arith.constant 0 : index
    %5 = vector.load %arg1[%c1_2, %c0_3] : memref<48x128xf32, #tpu.memory_space<vmem>>, vector<1x128xf32>
    %6 = arith.subf %4, %5 : vector<1x128xf32>
    %c4_i32 = arith.constant 4 : i32
    %7 = vector.broadcast %c4_i32 : i32 to vector<15x1xi32>
    %8 = arith.cmpi eq, %3, %7 : vector<15x1xi32>
    %9 = vector.shape_cast %8 : vector<15x1xi1> to vector<15x1xi1>
    %10 = vector.broadcast %9 : vector<15x1xi1> to vector<15x128xi1>
    %11 = vector.shape_cast %6 : vector<1x128xf32> to vector<1x128xf32>
    %12 = vector.broadcast %11 : vector<1x128xf32> to vector<15x128xf32>
    %13 = arith.select %10, %12, %2 : vector<15x128xi1>, vector<15x128xf32>
    %14 = vector.extract_strided_slice %0 {offsets = [7, 0], sizes = [1, 128], strides = [1, 1]} : vector<15x128xf32> to vector<1x128xf32>
    %c1_4 = arith.constant 1 : index
    %c0_5 = arith.constant 0 : index
    %15 = vector.load %arg1[%c1_4, %c0_5] : memref<48x128xf32, #tpu.memory_space<vmem>>, vector<1x128xf32>
    %16 = arith.subf %14, %15 : vector<1x128xf32>
    %c7_i32 = arith.constant 7 : i32
    %17 = vector.broadcast %c7_i32 : i32 to vector<15x1xi32>
    %18 = arith.cmpi eq, %3, %17 : vector<15x1xi32>
    %19 = vector.shape_cast %18 : vector<15x1xi1> to vector<15x1xi1>
    %20 = vector.broadcast %19 : vector<15x1xi1> to vector<15x128xi1>
    %21 = vector.shape_cast %16 : vector<1x128xf32> to vector<1x128xf32>
    %22 = vector.broadcast %21 : vector<1x128xf32> to vector<15x128xf32>
    %23 = arith.select %20, %22, %13 : vector<15x128xi1>, vector<15x128xf32>
    %24 = vector.extract_strided_slice %0 {offsets = [11, 0], sizes = [1, 128], strides = [1, 1]} : vector<15x128xf32> to vector<1x128xf32>
    %c8 = arith.constant 8 : index
    %c0_6 = arith.constant 0 : index
    %25 = vector.load %arg1[%c8, %c0_6] : memref<48x128xf32, #tpu.memory_space<vmem>>, vector<1x128xf32>
    %26 = arith.subf %24, %25 : vector<1x128xf32>
    %c11_i32 = arith.constant 11 : i32
    %27 = vector.broadcast %c11_i32 : i32 to vector<15x1xi32>
    %28 = arith.cmpi eq, %3, %27 : vector<15x1xi32>
    %29 = vector.shape_cast %28 : vector<15x1xi1> to vector<15x1xi1>
    %30 = vector.broadcast %29 : vector<15x1xi1> to vector<15x128xi1>
    %31 = vector.shape_cast %26 : vector<1x128xf32> to vector<1x128xf32>
    %32 = vector.broadcast %31 : vector<1x128xf32> to vector<15x128xf32>
    %33 = arith.select %30, %32, %23 : vector<15x128xi1>, vector<15x128xf32>
    %c17 = arith.constant 17 : index
    %c0_7 = arith.constant 0 : index
    %34 = vector.load %arg1[%c17, %c0_7] : memref<48x128xf32, #tpu.memory_space<vmem>>, vector<15x128xf32>
    %c16 = arith.constant 16 : index
    %c0_8 = arith.constant 0 : index
    %35 = vector.load %arg1[%c16, %c0_8] : memref<48x128xf32, #tpu.memory_space<vmem>>, vector<15x128xf32>
    %36 = arith.subf %34, %35 : vector<15x128xf32>
    %37 = tpu.iota {dimensions = array<i32: 0>} : vector<15x1xi32>
    %38 = vector.extract_strided_slice %34 {offsets = [4, 0], sizes = [1, 128], strides = [1, 1]} : vector<15x128xf32> to vector<1x128xf32>
    %c17_9 = arith.constant 17 : index
    %c0_10 = arith.constant 0 : index
    %39 = vector.load %arg1[%c17_9, %c0_10] : memref<48x128xf32, #tpu.memory_space<vmem>>, vector<1x128xf32>
    %40 = arith.subf %38, %39 : vector<1x128xf32>
    %c4_i32_11 = arith.constant 4 : i32
    %41 = vector.broadcast %c4_i32_11 : i32 to vector<15x1xi32>
    %42 = arith.cmpi eq, %37, %41 : vector<15x1xi32>
    %43 = vector.shape_cast %42 : vector<15x1xi1> to vector<15x1xi1>
    %44 = vector.broadcast %43 : vector<15x1xi1> to vector<15x128xi1>
    %45 = vector.shape_cast %40 : vector<1x128xf32> to vector<1x128xf32>
    %46 = vector.broadcast %45 : vector<1x128xf32> to vector<15x128xf32>
    %47 = arith.select %44, %46, %36 : vector<15x128xi1>, vector<15x128xf32>
    %48 = vector.extract_strided_slice %34 {offsets = [7, 0], sizes = [1, 128], strides = [1, 1]} : vector<15x128xf32> to vector<1x128xf32>
    %c17_12 = arith.constant 17 : index
    %c0_13 = arith.constant 0 : index
    %49 = vector.load %arg1[%c17_12, %c0_13] : memref<48x128xf32, #tpu.memory_space<vmem>>, vector<1x128xf32>
    %50 = arith.subf %48, %49 : vector<1x128xf32>
    %c7_i32_14 = arith.constant 7 : i32
    %51 = vector.broadcast %c7_i32_14 : i32 to vector<15x1xi32>
    %52 = arith.cmpi eq, %37, %51 : vector<15x1xi32>
    %53 = vector.shape_cast %52 : vector<15x1xi1> to vector<15x1xi1>
    %54 = vector.broadcast %53 : vector<15x1xi1> to vector<15x128xi1>
    %55 = vector.shape_cast %50 : vector<1x128xf32> to vector<1x128xf32>
    %56 = vector.broadcast %55 : vector<1x128xf32> to vector<15x128xf32>
    %57 = arith.select %54, %56, %47 : vector<15x128xi1>, vector<15x128xf32>
    %58 = vector.extract_strided_slice %34 {offsets = [11, 0], sizes = [1, 128], strides = [1, 1]} : vector<15x128xf32> to vector<1x128xf32>
    %c24 = arith.constant 24 : index
    %c0_15 = arith.constant 0 : index
    %59 = vector.load %arg1[%c24, %c0_15] : memref<48x128xf32, #tpu.memory_space<vmem>>, vector<1x128xf32>
    %60 = arith.subf %58, %59 : vector<1x128xf32>
    %c11_i32_16 = arith.constant 11 : i32
    %61 = vector.broadcast %c11_i32_16 : i32 to vector<15x1xi32>
    %62 = arith.cmpi eq, %37, %61 : vector<15x1xi32>
    %63 = vector.shape_cast %62 : vector<15x1xi1> to vector<15x1xi1>
    %64 = vector.broadcast %63 : vector<15x1xi1> to vector<15x128xi1>
    %65 = vector.shape_cast %60 : vector<1x128xf32> to vector<1x128xf32>
    %66 = vector.broadcast %65 : vector<1x128xf32> to vector<15x128xf32>
    %67 = arith.select %64, %66, %57 : vector<15x128xi1>, vector<15x128xf32>
    %c33 = arith.constant 33 : index
    %c0_17 = arith.constant 0 : index
    %68 = vector.load %arg1[%c33, %c0_17] : memref<48x128xf32, #tpu.memory_space<vmem>>, vector<15x128xf32>
    %c32 = arith.constant 32 : index
    %c0_18 = arith.constant 0 : index
    %69 = vector.load %arg1[%c32, %c0_18] : memref<48x128xf32, #tpu.memory_space<vmem>>, vector<15x128xf32>
    %70 = arith.subf %68, %69 : vector<15x128xf32>
    %71 = tpu.iota {dimensions = array<i32: 0>} : vector<15x1xi32>
    %72 = vector.extract_strided_slice %68 {offsets = [4, 0], sizes = [1, 128], strides = [1, 1]} : vector<15x128xf32> to vector<1x128xf32>
    %c33_19 = arith.constant 33 : index
    %c0_20 = arith.constant 0 : index
    %73 = vector.load %arg1[%c33_19, %c0_20] : memref<48x128xf32, #tpu.memory_space<vmem>>, vector<1x128xf32>
    %74 = arith.subf %72, %73 : vector<1x128xf32>
    %c4_i32_21 = arith.constant 4 : i32
    %75 = vector.broadcast %c4_i32_21 : i32 to vector<15x1xi32>
    %76 = arith.cmpi eq, %71, %75 : vector<15x1xi32>
    %77 = vector.shape_cast %76 : vector<15x1xi1> to vector<15x1xi1>
    %78 = vector.broadcast %77 : vector<15x1xi1> to vector<15x128xi1>
    %79 = vector.shape_cast %74 : vector<1x128xf32> to vector<1x128xf32>
    %80 = vector.broadcast %79 : vector<1x128xf32> to vector<15x128xf32>
    %81 = arith.select %78, %80, %70 : vector<15x128xi1>, vector<15x128xf32>
    %82 = vector.extract_strided_slice %68 {offsets = [7, 0], sizes = [1, 128], strides = [1, 1]} : vector<15x128xf32> to vector<1x128xf32>
    %c33_22 = arith.constant 33 : index
    %c0_23 = arith.constant 0 : index
    %83 = vector.load %arg1[%c33_22, %c0_23] : memref<48x128xf32, #tpu.memory_space<vmem>>, vector<1x128xf32>
    %84 = arith.subf %82, %83 : vector<1x128xf32>
    %c7_i32_24 = arith.constant 7 : i32
    %85 = vector.broadcast %c7_i32_24 : i32 to vector<15x1xi32>
    %86 = arith.cmpi eq, %71, %85 : vector<15x1xi32>
    %87 = vector.shape_cast %86 : vector<15x1xi1> to vector<15x1xi1>
    %88 = vector.broadcast %87 : vector<15x1xi1> to vector<15x128xi1>
    %89 = vector.shape_cast %84 : vector<1x128xf32> to vector<1x128xf32>
    %90 = vector.broadcast %89 : vector<1x128xf32> to vector<15x128xf32>
    %91 = arith.select %88, %90, %81 : vector<15x128xi1>, vector<15x128xf32>
    %92 = vector.extract_strided_slice %68 {offsets = [11, 0], sizes = [1, 128], strides = [1, 1]} : vector<15x128xf32> to vector<1x128xf32>
    %c40 = arith.constant 40 : index
    %c0_25 = arith.constant 0 : index
    %93 = vector.load %arg1[%c40, %c0_25] : memref<48x128xf32, #tpu.memory_space<vmem>>, vector<1x128xf32>
    %94 = arith.subf %92, %93 : vector<1x128xf32>
    %c11_i32_26 = arith.constant 11 : i32
    %95 = vector.broadcast %c11_i32_26 : i32 to vector<15x1xi32>
    %96 = arith.cmpi eq, %71, %95 : vector<15x1xi32>
    %97 = vector.shape_cast %96 : vector<15x1xi1> to vector<15x1xi1>
    %98 = vector.broadcast %97 : vector<15x1xi1> to vector<15x128xi1>
    %99 = vector.shape_cast %94 : vector<1x128xf32> to vector<1x128xf32>
    %100 = vector.broadcast %99 : vector<1x128xf32> to vector<15x128xf32>
    %101 = arith.select %98, %100, %91 : vector<15x128xi1>, vector<15x128xf32>
    %c1_27 = arith.constant 1 : index
    %c0_28 = arith.constant 0 : index
    %102 = vector.load %arg2[%c1_27, %c0_28] : memref<48x128xf32, #tpu.memory_space<vmem>>, vector<15x128xf32>
    %c0_29 = arith.constant 0 : index
    %c0_30 = arith.constant 0 : index
    %103 = vector.load %arg2[%c0_29, %c0_30] : memref<48x128xf32, #tpu.memory_space<vmem>>, vector<15x128xf32>
    %104 = arith.subf %102, %103 : vector<15x128xf32>
    %105 = tpu.iota {dimensions = array<i32: 0>} : vector<15x1xi32>
    %106 = vector.extract_strided_slice %102 {offsets = [4, 0], sizes = [1, 128], strides = [1, 1]} : vector<15x128xf32> to vector<1x128xf32>
    %c1_31 = arith.constant 1 : index
    %c0_32 = arith.constant 0 : index
    %107 = vector.load %arg2[%c1_31, %c0_32] : memref<48x128xf32, #tpu.memory_space<vmem>>, vector<1x128xf32>
    %108 = arith.subf %106, %107 : vector<1x128xf32>
    %c4_i32_33 = arith.constant 4 : i32
    %109 = vector.broadcast %c4_i32_33 : i32 to vector<15x1xi32>
    %110 = arith.cmpi eq, %105, %109 : vector<15x1xi32>
    %111 = vector.shape_cast %110 : vector<15x1xi1> to vector<15x1xi1>
    %112 = vector.broadcast %111 : vector<15x1xi1> to vector<15x128xi1>
    %113 = vector.shape_cast %108 : vector<1x128xf32> to vector<1x128xf32>
    %114 = vector.broadcast %113 : vector<1x128xf32> to vector<15x128xf32>
    %115 = arith.select %112, %114, %104 : vector<15x128xi1>, vector<15x128xf32>
    %116 = vector.extract_strided_slice %102 {offsets = [7, 0], sizes = [1, 128], strides = [1, 1]} : vector<15x128xf32> to vector<1x128xf32>
    %c1_34 = arith.constant 1 : index
    %c0_35 = arith.constant 0 : index
    %117 = vector.load %arg2[%c1_34, %c0_35] : memref<48x128xf32, #tpu.memory_space<vmem>>, vector<1x128xf32>
    %118 = arith.subf %116, %117 : vector<1x128xf32>
    %c7_i32_36 = arith.constant 7 : i32
    %119 = vector.broadcast %c7_i32_36 : i32 to vector<15x1xi32>
    %120 = arith.cmpi eq, %105, %119 : vector<15x1xi32>
    %121 = vector.shape_cast %120 : vector<15x1xi1> to vector<15x1xi1>
    %122 = vector.broadcast %121 : vector<15x1xi1> to vector<15x128xi1>
    %123 = vector.shape_cast %118 : vector<1x128xf32> to vector<1x128xf32>
    %124 = vector.broadcast %123 : vector<1x128xf32> to vector<15x128xf32>
    %125 = arith.select %122, %124, %115 : vector<15x128xi1>, vector<15x128xf32>
    %126 = vector.extract_strided_slice %102 {offsets = [11, 0], sizes = [1, 128], strides = [1, 1]} : vector<15x128xf32> to vector<1x128xf32>
    %c8_37 = arith.constant 8 : index
    %c0_38 = arith.constant 0 : index
    %127 = vector.load %arg2[%c8_37, %c0_38] : memref<48x128xf32, #tpu.memory_space<vmem>>, vector<1x128xf32>
    %128 = arith.subf %126, %127 : vector<1x128xf32>
    %c11_i32_39 = arith.constant 11 : i32
    %129 = vector.broadcast %c11_i32_39 : i32 to vector<15x1xi32>
    %130 = arith.cmpi eq, %105, %129 : vector<15x1xi32>
    %131 = vector.shape_cast %130 : vector<15x1xi1> to vector<15x1xi1>
    %132 = vector.broadcast %131 : vector<15x1xi1> to vector<15x128xi1>
    %133 = vector.shape_cast %128 : vector<1x128xf32> to vector<1x128xf32>
    %134 = vector.broadcast %133 : vector<1x128xf32> to vector<15x128xf32>
    %135 = arith.select %132, %134, %125 : vector<15x128xi1>, vector<15x128xf32>
    %c17_40 = arith.constant 17 : index
    %c0_41 = arith.constant 0 : index
    %136 = vector.load %arg2[%c17_40, %c0_41] : memref<48x128xf32, #tpu.memory_space<vmem>>, vector<15x128xf32>
    %c16_42 = arith.constant 16 : index
    %c0_43 = arith.constant 0 : index
    %137 = vector.load %arg2[%c16_42, %c0_43] : memref<48x128xf32, #tpu.memory_space<vmem>>, vector<15x128xf32>
    %138 = arith.subf %136, %137 : vector<15x128xf32>
    %139 = tpu.iota {dimensions = array<i32: 0>} : vector<15x1xi32>
    %140 = vector.extract_strided_slice %136 {offsets = [4, 0], sizes = [1, 128], strides = [1, 1]} : vector<15x128xf32> to vector<1x128xf32>
    %c17_44 = arith.constant 17 : index
    %c0_45 = arith.constant 0 : index
    %141 = vector.load %arg2[%c17_44, %c0_45] : memref<48x128xf32, #tpu.memory_space<vmem>>, vector<1x128xf32>
    %142 = arith.subf %140, %141 : vector<1x128xf32>
    %c4_i32_46 = arith.constant 4 : i32
    %143 = vector.broadcast %c4_i32_46 : i32 to vector<15x1xi32>
    %144 = arith.cmpi eq, %139, %143 : vector<15x1xi32>
    %145 = vector.shape_cast %144 : vector<15x1xi1> to vector<15x1xi1>
    %146 = vector.broadcast %145 : vector<15x1xi1> to vector<15x128xi1>
    %147 = vector.shape_cast %142 : vector<1x128xf32> to vector<1x128xf32>
    %148 = vector.broadcast %147 : vector<1x128xf32> to vector<15x128xf32>
    %149 = arith.select %146, %148, %138 : vector<15x128xi1>, vector<15x128xf32>
    %150 = vector.extract_strided_slice %136 {offsets = [7, 0], sizes = [1, 128], strides = [1, 1]} : vector<15x128xf32> to vector<1x128xf32>
    %c17_47 = arith.constant 17 : index
    %c0_48 = arith.constant 0 : index
    %151 = vector.load %arg2[%c17_47, %c0_48] : memref<48x128xf32, #tpu.memory_space<vmem>>, vector<1x128xf32>
    %152 = arith.subf %150, %151 : vector<1x128xf32>
    %c7_i32_49 = arith.constant 7 : i32
    %153 = vector.broadcast %c7_i32_49 : i32 to vector<15x1xi32>
    %154 = arith.cmpi eq, %139, %153 : vector<15x1xi32>
    %155 = vector.shape_cast %154 : vector<15x1xi1> to vector<15x1xi1>
    %156 = vector.broadcast %155 : vector<15x1xi1> to vector<15x128xi1>
    %157 = vector.shape_cast %152 : vector<1x128xf32> to vector<1x128xf32>
    %158 = vector.broadcast %157 : vector<1x128xf32> to vector<15x128xf32>
    %159 = arith.select %156, %158, %149 : vector<15x128xi1>, vector<15x128xf32>
    %160 = vector.extract_strided_slice %136 {offsets = [11, 0], sizes = [1, 128], strides = [1, 1]} : vector<15x128xf32> to vector<1x128xf32>
    %c24_50 = arith.constant 24 : index
    %c0_51 = arith.constant 0 : index
    %161 = vector.load %arg2[%c24_50, %c0_51] : memref<48x128xf32, #tpu.memory_space<vmem>>, vector<1x128xf32>
    %162 = arith.subf %160, %161 : vector<1x128xf32>
    %c11_i32_52 = arith.constant 11 : i32
    %163 = vector.broadcast %c11_i32_52 : i32 to vector<15x1xi32>
    %164 = arith.cmpi eq, %139, %163 : vector<15x1xi32>
    %165 = vector.shape_cast %164 : vector<15x1xi1> to vector<15x1xi1>
    %166 = vector.broadcast %165 : vector<15x1xi1> to vector<15x128xi1>
    %167 = vector.shape_cast %162 : vector<1x128xf32> to vector<1x128xf32>
    %168 = vector.broadcast %167 : vector<1x128xf32> to vector<15x128xf32>
    %169 = arith.select %166, %168, %159 : vector<15x128xi1>, vector<15x128xf32>
    %c33_53 = arith.constant 33 : index
    %c0_54 = arith.constant 0 : index
    %170 = vector.load %arg2[%c33_53, %c0_54] : memref<48x128xf32, #tpu.memory_space<vmem>>, vector<15x128xf32>
    %c32_55 = arith.constant 32 : index
    %c0_56 = arith.constant 0 : index
    %171 = vector.load %arg2[%c32_55, %c0_56] : memref<48x128xf32, #tpu.memory_space<vmem>>, vector<15x128xf32>
    %172 = arith.subf %170, %171 : vector<15x128xf32>
    %173 = tpu.iota {dimensions = array<i32: 0>} : vector<15x1xi32>
    %174 = vector.extract_strided_slice %170 {offsets = [4, 0], sizes = [1, 128], strides = [1, 1]} : vector<15x128xf32> to vector<1x128xf32>
    %c33_57 = arith.constant 33 : index
    %c0_58 = arith.constant 0 : index
    %175 = vector.load %arg2[%c33_57, %c0_58] : memref<48x128xf32, #tpu.memory_space<vmem>>, vector<1x128xf32>
    %176 = arith.subf %174, %175 : vector<1x128xf32>
    %c4_i32_59 = arith.constant 4 : i32
    %177 = vector.broadcast %c4_i32_59 : i32 to vector<15x1xi32>
    %178 = arith.cmpi eq, %173, %177 : vector<15x1xi32>
    %179 = vector.shape_cast %178 : vector<15x1xi1> to vector<15x1xi1>
    %180 = vector.broadcast %179 : vector<15x1xi1> to vector<15x128xi1>
    %181 = vector.shape_cast %176 : vector<1x128xf32> to vector<1x128xf32>
    %182 = vector.broadcast %181 : vector<1x128xf32> to vector<15x128xf32>
    %183 = arith.select %180, %182, %172 : vector<15x128xi1>, vector<15x128xf32>
    %184 = vector.extract_strided_slice %170 {offsets = [7, 0], sizes = [1, 128], strides = [1, 1]} : vector<15x128xf32> to vector<1x128xf32>
    %c33_60 = arith.constant 33 : index
    %c0_61 = arith.constant 0 : index
    %185 = vector.load %arg2[%c33_60, %c0_61] : memref<48x128xf32, #tpu.memory_space<vmem>>, vector<1x128xf32>
    %186 = arith.subf %184, %185 : vector<1x128xf32>
    %c7_i32_62 = arith.constant 7 : i32
    %187 = vector.broadcast %c7_i32_62 : i32 to vector<15x1xi32>
    %188 = arith.cmpi eq, %173, %187 : vector<15x1xi32>
    %189 = vector.shape_cast %188 : vector<15x1xi1> to vector<15x1xi1>
    %190 = vector.broadcast %189 : vector<15x1xi1> to vector<15x128xi1>
    %191 = vector.shape_cast %186 : vector<1x128xf32> to vector<1x128xf32>
    %192 = vector.broadcast %191 : vector<1x128xf32> to vector<15x128xf32>
    %193 = arith.select %190, %192, %183 : vector<15x128xi1>, vector<15x128xf32>
    %194 = vector.extract_strided_slice %170 {offsets = [11, 0], sizes = [1, 128], strides = [1, 1]} : vector<15x128xf32> to vector<1x128xf32>
    %c40_63 = arith.constant 40 : index
    %c0_64 = arith.constant 0 : index
    %195 = vector.load %arg2[%c40_63, %c0_64] : memref<48x128xf32, #tpu.memory_space<vmem>>, vector<1x128xf32>
    %196 = arith.subf %194, %195 : vector<1x128xf32>
    %c11_i32_65 = arith.constant 11 : i32
    %197 = vector.broadcast %c11_i32_65 : i32 to vector<15x1xi32>
    %198 = arith.cmpi eq, %173, %197 : vector<15x1xi32>
    %199 = vector.shape_cast %198 : vector<15x1xi1> to vector<15x1xi1>
    %200 = vector.broadcast %199 : vector<15x1xi1> to vector<15x128xi1>
    %201 = vector.shape_cast %196 : vector<1x128xf32> to vector<1x128xf32>
    %202 = vector.broadcast %201 : vector<1x128xf32> to vector<15x128xf32>
    %203 = arith.select %200, %202, %193 : vector<15x128xi1>, vector<15x128xf32>
    %204 = arith.mulf %33, %135 : vector<15x128xf32>
    %205 = arith.mulf %67, %169 : vector<15x128xf32>
    %206 = arith.addf %204, %205 : vector<15x128xf32>
    %207 = arith.mulf %101, %203 : vector<15x128xf32>
    %208 = arith.addf %206, %207 : vector<15x128xf32>
    %209 = arith.mulf %33, %33 : vector<15x128xf32>
    %210 = arith.mulf %67, %67 : vector<15x128xf32>
    %211 = arith.addf %209, %210 : vector<15x128xf32>
    %212 = arith.mulf %101, %101 : vector<15x128xf32>
    %213 = arith.addf %211, %212 : vector<15x128xf32>
    %214 = arith.mulf %135, %135 : vector<15x128xf32>
    %215 = arith.mulf %169, %169 : vector<15x128xf32>
    %216 = arith.addf %214, %215 : vector<15x128xf32>
    %217 = arith.mulf %203, %203 : vector<15x128xf32>
    %218 = arith.addf %216, %217 : vector<15x128xf32>
    %219 = arith.mulf %213, %218 : vector<15x128xf32>
    %cst = arith.constant 1.000000e-16 : f32
    %220 = vector.broadcast %cst : f32 to vector<15x128xf32>
    %221 = arith.maximumf %219, %220 : vector<15x128xf32>
    %222 = math.rsqrt %221 : vector<15x128xf32>
    %223 = arith.mulf %208, %222 : vector<15x128xf32>
    %cst_66 = arith.constant dense<0.000000e+00> : vector<128xf32>
    %224 = vector.multi_reduction <add>, %223, %cst_66 [0] : vector<15x128xf32> to vector<128xf32>
    %225 = vector.shape_cast %224 : vector<128xf32> to vector<1x128xf32>
    %226 = tpu.iota {dimensions = array<i32: 1>} : vector<1x128xi32>
    %c128_i32 = arith.constant 128 : i32
    %227 = arith.muli %arg0, %c128_i32 : i32
    %228 = vector.broadcast %227 : i32 to vector<1x128xi32>
    %229 = arith.addi %226, %228 : vector<1x128xi32>
    %c2_i32 = arith.constant 2 : i32
    %230 = vector.broadcast %c2_i32 : i32 to vector<1x128xi32>
    %231 = arith.cmpi slt, %229, %230 : vector<1x128xi32>
    %cst_67 = arith.constant 0.000000e+00 : f32
    %232 = vector.broadcast %cst_67 : f32 to vector<1x128xf32>
    %233 = arith.select %231, %225, %232 : vector<1x128xi1>, vector<1x128xf32>
    %cst_68 = arith.constant dense<0.000000e+00> : vector<1xf32>
    %234 = vector.multi_reduction <add>, %233, %cst_68 [1] : vector<1x128xf32> to vector<1xf32>
    %235 = vector.shape_cast %234 : vector<1xf32> to vector<1x1xf32>
    %236 = vector.shape_cast %235 : vector<1x1xf32> to vector<1x1xf32>
    %237 = vector.broadcast %236 : vector<1x1xf32> to vector<1x128xf32>
    %c0_69 = arith.constant 0 : index
    %c0_70 = arith.constant 0 : index
    %238 = vector.load %arg3[%c0_69, %c0_70] : memref<1x128xf32, #tpu.memory_space<vmem>>, vector<1x128xf32>
    tpu.vector_store %arg3[%c0_69, %c0_70], %237 {strides = array<i32>} : memref<1x128xf32, #tpu.memory_space<vmem>>, vector<1x128xf32>,
    return
  }
  func.func @transform_0(%arg0: i32) -> (i32, i32) {
    %c0_i32 = arith.constant 0 : i32
    %c0_i32_0 = arith.constant 0 : i32
    return %c0_i32, %arg0 : i32, i32
  }
  func.func @transform_1(%arg0: i32) -> (i32, i32) {
    %c0_i32 = arith.constant 0 : i32
    %c0_i32_0 = arith.constant 0 : i32
    return %c0_i32, %arg0 : i32, i32
  }
  func.func @transform_2(%arg0: i32) -> (i32, i32) {
    %c0_i32 = arith.constant 0 : i32
    %c0_i32_0 = arith.constant 0 : i32
    return %c0_i32, %arg0 : i32, i32
  }
}

</mosaic_0001>

<bundles_post_ra>
// kernel: tpu_custom_call.1
= control target key start
LH: loop header
LB: loop body
LE: loop exit
PB: predicated region body
PF: predicated region fallthrough
CT: control target
= control target key end

     0   :  { %7 = vsyncpa [#allocation3], 0  ;;  %s594_s0 = inlined_call_operand.hbm [shape: f32[48,128], index: 0, kind: input, shape index: {}]   ;;  %s595_s1 = inlined_call_operand.hbm [shape: f32[48,128], index: 1, kind: input, shape index: {}]   ;;  %s596_s2 = inlined_call_operand.hbm [shape: f32[1,128], index: 2, kind: output, shape index: {}]  }
   0x1   :  { %8 = vsyncpa [#allocation6], 0 }
   0x2   :  { %9 = vsyncpa [#allocation4], 0  ;;  %s437_s9 = smov [#allocation2]   ;;  %s365_s13 = scalar_lea.hbm %s594_s0, 768 }
   0x3   :  { %s15_s10 = sshll.u32 %s437_s9, 4  ;;  %p366_p0 = scmp.ne.s32.totalorder %s594_s0, %s365_s13  ;;  %s16_s10 = int_to_ptr.vmem [resolvable:$true] %s15_s10 }
   0x4   :  { %p369_p1 = scmp.lt.u32.totalorder %s365_s13, %s594_s0 }
   0x6   :  { %p371_p2 = pnand %p369_p1, %p366_p0 }
   0x8   :  { %374 = shalt.err (!%p371_p2)
}
   0x9   :  { %s375_s18 = scalar_lea.vmem %s16_s10, 768  ;;  %p380_p4 = scmp.lt.s32.totalorder %s16_s10, %s16_s10 }
   0xa   :  { %p376_p3 = scmp.ne.s32.totalorder %s16_s10, %s375_s18  ;;  %p381_p5 = scmp.lt.s32.totalorder %s375_s18, %s375_s18 }
   0xc   :  { %p382_p6 = por %p381_p5, %p380_p4 }
   0xe   :  { %p383_p7 = pnand %p382_p6, %p376_p3 }
  0x10   :  { %386 = shalt.err (!%p383_p7)
}
  0x11   :  { %s438_s19 = smov 128   ;;  %s439_s20 = smov 8  }
  0x12   :  { %21 = dma.hbm_to_vmem [thread:$0]  %s594_s0, 768, %s16_s10, [#allocation3], %s438_s19, %s438_s19, %s439_s20  }
  0x13   :  { %s440_s23 = smov [#allocation5]   ;;  %s387_s27 = scalar_lea.hbm %s595_s1, 768 }
  0x14   :  { %s27_s24 = sshll.u32 %s440_s23, 4  ;;  %p388_p8 = scmp.ne.s32.totalorder %s595_s1, %s387_s27  ;;  %s28_s24 = int_to_ptr.vmem [resolvable:$true] %s27_s24 }
  0x15   :  { %p391_p9 = scmp.lt.u32.totalorder %s387_s27, %s595_s1 }
  0x17   :  { %p393_p10 = pnand %p391_p9, %p388_p8 }
  0x19   :  { %396 = shalt.err (!%p393_p10)
}
  0x1a   :  { %s397_s4 = scalar_lea.vmem %s28_s24, 768  ;;  %p402_p12 = scmp.lt.s32.totalorder %s28_s24, %s28_s24 }
  0x1b   :  { %p398_p11 = scmp.ne.s32.totalorder %s28_s24, %s397_s4  ;;  %p403_p13 = scmp.lt.s32.totalorder %s397_s4, %s397_s4 }
  0x1d   :  { %p404_p0 = por %p403_p13, %p402_p12 }
  0x1f   :  { %p405_p1 = pnand %p404_p0, %p398_p11 }
  0x21   :  { %408 = shalt.err (!%p405_p1)
}
  0x22   :  { %33 = dma.hbm_to_vmem [thread:$0]  %s595_s1, 768, %s28_s24, [#allocation6], %s438_s19, %s438_s19, %s439_s20  }
  0x23   :  { %431 = dma.done.wait [#allocation3], 768  }
  0x24   :  { %432 = vsyncadd [#allocation3], 4294966528 }
  0x25   :  { %433 = dma.done.wait [#allocation6], 768  }
  0x26   :  { %434 = vsyncadd [#allocation6], 4294966528  ;;  %v46_v0 = vlaneseq  ;;  %v40_v2 = vld [vmem:[#allocation2 + $0x1] sm:$0xff]  ;;  %v41_v4 = vld [vmem:[#allocation2 + $0x9] sm:$0x7f]  ;;  %vm321_vm3 = vcmask 1046528  }
  0x27   :  { %v49_v5 = vld [vmem:[#allocation2 + $0x1] sm:$0x1]  ;;  %v81_v6 = vld [vmem:[#allocation2 + $0x8] sm:$0x1]  ;;  %v104_v14 = vld [vmem:[#allocation2 + $0x11] sm:$0x1] }
  0x28   :  { %v482_v1 = vshrl.u32 %v46_v0, 7  ;;  %v42_v7 = vld [vmem:[#allocation2] sm:$0xff]  ;;  %v51_v8 = vrot.slane %v49_v5, 4  ;;  %v66_v10 = vrot.slane %v49_v5, 1  ;;  %v83_v11 = vrot.slane %v81_v6, 5  ;;  %v98_v19 = vld [vmem:[#allocation2 + $0x11] sm:$0xff] }
  0x29   :  { %v43_v12 = vld [vmem:[#allocation2 + $0x8] sm:$0x7f]  ;;  %v99_v20 = vld [vmem:[#allocation2 + $0x19] sm:$0x7f]  ;;  %v124_v21 = vld [vmem:[#allocation2 + $0x18] sm:$0x1]  ;;  %v44_v22 = vsub.f32 %v40_v2, %v42_v7 }
  0x2a   :  { %v485_v3 = vadd.s32 8, %v482_v1  ;;  %vm54_vm0 = vcmp.eq.s32.totalorder %v482_v1, 4  ;;  %v489_v9 = vsub.s32 4, %v482_v1  ;;  %vm69_vm1 = vcmp.eq.s32.totalorder %v482_v1, 7  ;;  %v100_v27 = vld [vmem:[#allocation2 + $0x10] sm:$0xff]  ;;  %v135_v34 = vld [vmem:[#allocation2 + $0x21] sm:$0xff] }
  0x2b   :  { %v493_v13 = vsub.s32 3, %v482_v1  ;;  %v53_v15 = vsub.f32 %v40_v2, %v51_v8  ;;  %v68_v16 = vsub.f32 %v40_v2, %v66_v10  ;;  %v496_v17 = vsub.s32 7, %v482_v1  ;;  %v101_v28 = vld [vmem:[#allocation2 + $0x18] sm:$0x7f]  ;;  %v141_v29 = vld [vmem:[#allocation2 + $0x21] sm:$0x1] }
  0x2c   :  { %v85_v18 = vsub.f32 %v41_v4, %v83_v11  ;;  %v106_v23 = vrot.slane %v104_v14, 4  ;;  %v115_v24 = vrot.slane %v104_v14, 1  ;;  %v126_v25 = vrot.slane %v124_v21, 5  ;;  %v137_v35 = vld [vmem:[#allocation2 + $0x20] sm:$0xff]  ;;  %v161_v36 = vld [vmem:[#allocation2 + $0x28] sm:$0x1] }
  0x2d   :  { %v63_v26 = vrot.slane %v53_v15, %v489_v9  ;;  %vm87_vm2 = vcmp.eq.s32.totalorder %v485_v3, 11  ;;  %v45_v30 = vsub.f32 %v41_v4, %v43_v12  ;;  %v78_v37 = vrot.slane %v68_v16, %v496_v17  ;;  %v502_v39 = vld [vmem:[#allocation2 + $0x28] sm:$0x7f]  ;;  %v178_v42 = vld [vmem:[#allocation5 + $0x1] sm:$0x1]  ;;  %v211_v16 = vld [vmem:[#allocation5 + $0x10] sm:$0xff] }
  0x2e   :  { %v95_v31 = vrot.slane %v85_v18, %v493_v13  ;;  %v108_v32 = vsub.f32 %v98_v19, %v106_v23  ;;  %v128_v33 = vsub.f32 %v99_v20, %v126_v25  ;;  %v117_v38 = vsub.f32 %v98_v19, %v115_v24  ;;  %v136_v47 = vld [vmem:[#allocation2 + $0x29] sm:$0x7f]  ;;  %v172_v52 = vld [vmem:[#allocation5 + $0x1] sm:$0xff]  ;;  %v215_v59 = vld [vmem:[#allocation5 + $0x11] sm:$0x1]  ;;  %s441_s1 = smov [#allocation7]  }
  0x2f   :  { %v143_v40 = vrot.slane %v141_v29, 4  ;;  %v152_v41 = vrot.slane %v141_v29, 1  ;;  %v64_v43 = vsel %vm54_vm0, %v63_v26, %v44_v22  ;;  %v102_v44 = vsub.f32 %v98_v19, %v100_v27  ;;  %v174_v53 = vld [vmem:[#allocation5] sm:$0xff]  ;;  %v198_v54 = vld [vmem:[#allocation5 + $0x8] sm:$0x1]  ;;  %v209_v8 = vld [vmem:[#allocation5 + $0x11] sm:$0xff] }
  0x30   :  { %v103_v45 = vsub.f32 %v99_v20, %v101_v28  ;;  %v112_v46 = vrot.slane %v108_v32, %v489_v9  ;;  %v132_v48 = vrot.slane %v128_v33, %v493_v13  ;;  %v163_v51 = vrot.slane %v161_v36, 5  ;;  %v173_v2 = vld [vmem:[#allocation5 + $0x9] sm:$0x7f]  ;;  %v235_v10 = vld [vmem:[#allocation5 + $0x18] sm:$0x1]  ;;  %s346_s6 = sshll.u32 %s441_s1, 4  ;;  %s347_s6 = int_to_ptr.vmem [resolvable:$true] %s346_s6 }
  0x31   :  { %v145_v49 = vsub.f32 %v135_v34, %v143_v40  ;;  %v154_v50 = vsub.f32 %v135_v34, %v152_v41  ;;  %v510_v55 = vsel %vm87_vm2, %v95_v31, %v45_v30  ;;  %v139_v56 = vsub.f32 %v135_v34, %v137_v35  ;;  %v175_v15 = vld [vmem:[#allocation5 + $0x8] sm:$0x7f]  ;;  %v212_v18 = vld [vmem:[#allocation5 + $0x18] sm:$0x7f]  ;;  %v252_v29 = vld [vmem:[#allocation5 + $0x21] sm:$0x1]  ;;  %p414_p3 = scmp.lt.s32.totalorder %s347_s6, %s347_s6 }
  0x32   :  { %v140_v57 = vsub.f32 %v136_v47, %v502_v39  ;;  %v180_v58 = vrot.slane %v178_v42, 4  ;;  %v515_v60 = vsel %vm69_vm1, %v78_v37, %v64_v43  ;;  %v121_v61 = vrot.slane %v117_v38, %v496_v17  ;;  %v210_v24 = vld [vmem:[#allocation5 + $0x19] sm:$0x7f]  ;;  %v248_v34 = vld [vmem:[#allocation5 + $0x20] sm:$0xff]  ;;  %v272_v35 = vld [vmem:[#allocation5 + $0x28] sm:$0x1] }
  0x33   :  { %v149_v62 = vrot.slane %v145_v49, %v489_v9  ;;  %v165_v63 = vsub.f32 %v136_v47, %v163_v51  ;;  %v176_v4 = vsub.f32 %v172_v52, %v174_v53  ;;  %v189_v6 = vrot.slane %v178_v42, 1  ;;  %v246_v40 = vld [vmem:[#allocation5 + $0x21] sm:$0xff]  ;;  %v247_v43 = vld [vmem:[#allocation5 + $0x29] sm:$0x7f]  ;;  %s409_s7 = scalar_lea.vmem %s347_s6, 16  ;;  %s413_s8 = scalar_lea.vmem %s347_s6, 32 }
  0x34   :  { %v182_v5 = vsub.f32 %v172_v52, %v180_v58  ;;  %v200_v7 = vrot.slane %v198_v54, 5  ;;  %v113_v11 = vsel %vm54_vm0, %v112_v46, %v102_v44  ;;  %v523_v12 = vsel %vm87_vm2, %v132_v48, %v103_v45  ;;  %v249_v44 = vld [vmem:[#allocation5 + $0x28] sm:$0x7f]  ;;  %p410_p2 = scmp.ne.s32.totalorder %s347_s6, %s409_s7  ;;  %p415_p4 = scmp.lt.s32.totalorder %s413_s8, %s409_s7 }
  0x35   :  { %v158_v14 = vrot.slane %v154_v50, %v496_v17  ;;  %v217_v19 = vrot.slane %v215_v59, 4  ;;  %v150_v20 = vsel %vm54_vm0, %v149_v62, %v139_v56  ;;  %v169_v21 = vrot.slane %v165_v63, %v493_v13 }
  0x36   :  { %v191_v22 = vsub.f32 %v172_v52, %v189_v6  ;;  %v202_v23 = vsub.f32 %v173_v2, %v200_v7  ;;  %v186_v25 = vrot.slane %v182_v5, %v489_v9  ;;  %v226_v27 = vrot.slane %v215_v59, 1  ;;  %p416_p5 = por %p415_p4, %p414_p3 }
  0x37   :  { %v219_v26 = vsub.f32 %v209_v8, %v217_v19  ;;  %v237_v28 = vrot.slane %v235_v10, 5  ;;  %v532_v30 = vsel %vm69_vm1, %v121_v61, %v113_v11  ;;  %v177_v31 = vsub.f32 %v173_v2, %v175_v15 }
  0x38   :  { %v213_v32 = vsub.f32 %v209_v8, %v211_v16  ;;  %v214_v33 = vsub.f32 %v210_v24, %v212_v18  ;;  %v536_v36 = vsel %vm69_vm1, %v158_v14, %v150_v20  ;;  %v228_v38 = vsub.f32 %v209_v8, %v226_v27  ;;  %p417_p6 = pnand %p416_p5, %p410_p2 }
  0x39   :  { %v223_v37 = vrot.slane %v219_v26, %v489_v9  ;;  %v239_v39 = vsub.f32 %v210_v24, %v237_v28  ;;  %v195_v41 = vrot.slane %v191_v22, %v496_v17  ;;  %v206_v42 = vrot.slane %v202_v23, %v493_v13 }
  0x3a   :  { %v254_v45 = vrot.slane %v252_v29, 4  ;;  %v263_v46 = vrot.slane %v252_v29, 1  ;;  %v171_v47 = vsel %vm87_vm2, %v169_v21, %v140_v57  ;;  %v187_v48 = vsel %vm54_vm0, %v186_v25, %v176_v4 }
  0x3b   :  { %v250_v49 = vsub.f32 %v246_v40, %v248_v34  ;;  %v274_v50 = vrot.slane %v272_v35, 5  ;;  %v232_v51 = vrot.slane %v228_v38, %v496_v17  ;;  %v243_v52 = vrot.slane %v239_v39, %v493_v13 }
  0x3c   :  { %v256_v53 = vsub.f32 %v246_v40, %v254_v45  ;;  %v265_v54 = vsub.f32 %v246_v40, %v263_v46  ;;  %v224_v56 = vsel %vm54_vm0, %v223_v37, %v213_v32  ;;  %v251_v58 = vsub.f32 %v247_v43, %v249_v44 }
  0x3d   :  { %v276_v59 = vsub.f32 %v247_v43, %v274_v50  ;;  %v293_v61 = vmul.f32 %v515_v60, %v515_v60  ;;  %v196_v57 = vsel %vm69_vm1, %v195_v41, %v187_v48  ;;  %v208_v62 = vsel %vm87_vm2, %v206_v42, %v177_v31 }
  0x3e   :  { %v260_v63 = vrot.slane %v256_v53, %v489_v9  ;;  %v269_v2 = vrot.slane %v265_v54, %v496_v17  ;;  %v294_v5 = vmul.f32 %v510_v55, %v510_v55  ;;  %v295_v6 = vmul.f32 %v532_v30, %v532_v30 }
  0x3f   :  { %v280_v4 = vrot.slane %v276_v59, %v493_v13  ;;  %v296_v7 = vmul.f32 %v523_v12, %v523_v12  ;;  %v233_v8 = vsel %vm69_vm1, %v232_v51, %v224_v56  ;;  %v245_v10 = vsel %vm87_vm2, %v243_v52, %v214_v33 }
  0x40   :  { %v261_v9 = vsel %vm54_vm0, %v260_v63, %v250_v49  ;;  %v299_v13 = vmul.f32 %v536_v36, %v536_v36  ;;  %v297_v11 = vadd.f32 %v295_v6, %v293_v61  ;;  %v300_v16 = vmul.f32 %v171_v47, %v171_v47 }
  0x41   :  { %v270_v17 = vsel %vm69_vm1, %v269_v2, %v261_v9  ;;  %v298_v14 = vadd.f32 %v296_v7, %v294_v5  ;;  %v282_v15 = vsel %vm87_vm2, %v280_v4, %v251_v58  ;;  %v303_v18 = vmul.f32 %v196_v57, %v196_v57 }
  0x42   :  { %v304_v19 = vmul.f32 %v208_v62, %v208_v62  ;;  %v305_v20 = vmul.f32 %v233_v8, %v233_v8  ;;  %v306_v21 = vmul.f32 %v245_v10, %v245_v10  ;;  %v301_v22 = vadd.f32 %v299_v13, %v297_v11 }
  0x43   :  { %v309_v23 = vmul.f32 %v270_v17, %v270_v17  ;;  %v302_v24 = vadd.f32 %v300_v16, %v298_v14  ;;  %v310_v27 = vmul.f32 %v282_v15, %v282_v15  ;;  %v283_v3 = vmul.f32 %v196_v57, %v515_v60 }
  0x44   :  { %v307_v25 = vadd.f32 %v305_v20, %v303_v18  ;;  %v308_v26 = vadd.f32 %v306_v21, %v304_v19  ;;  %v285_v34 = vmul.f32 %v233_v8, %v532_v30  ;;  %v284_v35 = vmul.f32 %v208_v62, %v510_v55 }
  0x45   :  { %v286_v37 = vmul.f32 %v245_v10, %v523_v12  ;;  %v289_v39 = vmul.f32 %v270_v17, %v536_v36  ;;  %v290_v41 = vmul.f32 %v282_v15, %v171_v47  ;;  %v331_v12 = vand.u32 127, %v46_v0 }
  0x46   :  { %v311_v28 = vadd.f32 %v309_v23, %v307_v25  ;;  %v312_v29 = vadd.f32 %v310_v27, %v308_v26  ;;  %v287_v38 = vadd.f32 %v285_v34, %v283_v3 }
  0x47   :  { %v288_v40 = vadd.f32 %v286_v37, %v284_v35  ;;  %vm335_vm4 = vcmp.lt.s32.totalorder %v331_v12, 2 }
  0x48   :  { %v313_v1 = vmul.f32 %v311_v28, %v301_v22  ;;  %v314_v31 = vmul.f32 %v312_v29, %v302_v24  ;;  %v291_v42 = vadd.f32 %v289_v39, %v287_v38 }
  0x49   :  { %v292_v43 = vadd.f32 %v290_v41, %v288_v40 }
  0x4a   :  { %v315_v32 = vmax.f32 %v313_v1, 1e-16  ;;  %v316_v33 = vmax.f32 %v314_v31, 1e-16 }
  0x4c   :  { %361 = vrsqrt.f32 %v315_v32 }
  0x4d   :  { %363 = vrsqrt.f32 %v316_v33 }
  0x56   :  { %v362_v44 = vpop.eup %361 }
  0x57   :  { %v364_v45 = vpop.eup %363  ;;  %v319_v46 = vmul.f32 %v362_v44, %v291_v42 }
  0x58   :  { %v320_v60 = vmul.f32 %v364_v45, %v292_v43 }
  0x5a   :  { %v322_v48 = vsel %vm321_vm3, %v320_v60, 0.0 }
  0x5b   :  { %v323_v30 = vadd.f32 %v322_v48, %v319_v46 }
  0x5d   :  { %v324_v49 = vrot.slane %v323_v30, 4 }
  0x5f   :  { %v325_v55 = vadd.f32 %v324_v49, %v323_v30 }
  0x61   :  { %v326_v50 = vrot.slane %v325_v55, 2 }
  0x63   :  { %v327_v51 = vadd.f32 %v326_v50, %v325_v55 }
  0x65   :  { %v328_v52 = vrot.slane %v327_v51, 1 }
  0x67   :  { %v329_v36 = vadd.f32 %v328_v52, %v327_v51 }
  0x69   :  { %v336_v53 = vsel %vm335_vm4, %v329_v36, 0.0 }
  0x6a   :  { %337 = vadd.xlane.f32.xlu0 %v336_v53 }
  0xf7   :  { %v338_v47 = vpop.xlane.xlu0 %337 }
  0xf8   :  { %339 = vst [vmem:[#allocation7] sm:$0x1] %v338_v47 }
  0xf9   :  { %420 = shalt.err (!%p417_p6)
}
  0xfa   :  { %s421_s11 = scalar_lea.hbm %s596_s2, 16 }
  0xfb   :  { %p422_p7 = scmp.ne.s32.totalorder %s596_s2, %s421_s11  ;;  %p425_p8 = scmp.lt.u32.totalorder %s421_s11, %s596_s2 }
  0xfd   :  { %p427_p9 = pnand %p425_p8, %p422_p7 }
  0xff   :  { %430 = shalt.err (!%p427_p9)
}
 0x100   :  { %349 = dma.vmem_to_hbm [thread:$0]  %s347_s6, 16, %s596_s2, [#allocation4]  }
 0x101   :  { %435 = dma.done.wait [#allocation4], 16  }
 0x102   :  { %436 = vsyncadd [#allocation4], 4294967280 }
 0x103   :  { %353 = vsyncpa [#allocation3], 1 }
 0x104   :  { %354 = vsyncpa [#allocation6], 1 }
 0x105   :  { %355 = vsyncpa [#allocation4], 1 }

</bundles_post_ra>
